<compile_context>
chip_gen: v6e
topology: v6e:2x2x1
jax: 0.10.0
libtpu: 0.0.40
codegen_flags: <defaults>
</compile_context>

<pallas_src>
import jax
import jax.numpy as jnp
from jax.experimental import pallas as pl
from jax.experimental.pallas import tpu as pltpu


_LANES = 128
_SUBLANES = 8
_VMEM_LIMIT = 32 * 1024 * 1024  # <= scoped default on every chip; plenty here


def _round_up(x, m):
    return ((x + m - 1) // m) * m


# --------------------------------------------------------------------------
# Kernels
# --------------------------------------------------------------------------
def _linear_sigmoid_kernel(x_ref, w_ref, b_ref, o_ref):
    # x_ref: (TILE_B, nz), w_ref: (nz, N_PAD), b_ref: (1, N_PAD),
    # o_ref: (TILE_B, N_PAD)
    z = jnp.dot(
        x_ref[...].astype(jnp.float32),
        w_ref[...],
        preferred_element_type=jnp.float32,
    )
    z = z + b_ref[...]                      # broadcast (1, N_PAD) over rows
    o_ref[...] = jax.nn.sigmoid(z).astype(o_ref.dtype)


def _sigmoid_kernel(x_ref, o_ref):
    o_ref[...] = jax.nn.sigmoid(x_ref[...].astype(jnp.float32)).astype(o_ref.dtype)


# --------------------------------------------------------------------------
# Wrappers
# --------------------------------------------------------------------------
def _sigmoid_only(x):
    """Lane-dense, row-tiled elementwise sigmoid (nz == 1 path)."""
    orig_shape = x.shape
    orig_dtype = x.dtype
    flat = x.reshape(-1)
    n = flat.shape[0]

    rows = _round_up(pl.cdiv(n, _LANES), _SUBLANES)
    n_pad = rows * _LANES
    flat = jnp.pad(flat, (0, n_pad - n))
    x2d = flat.reshape(rows, _LANES)

    tile_r = min(1024, rows)                # rows is a multiple of 8, so tile_r is too
    grid = (pl.cdiv(rows, tile_r),)

    out2d = pl.pallas_call(
        _sigmoid_kernel,
        out_shape=jax.ShapeDtypeStruct((rows, _LANES), orig_dtype),
        grid=grid,
        in_specs=[pl.BlockSpec((tile_r, _LANES), lambda i: (i, 0))],
        out_specs=pl.BlockSpec((tile_r, _LANES), lambda i: (i, 0)),
        compiler_params=pltpu.CompilerParams(
            dimension_semantics=("parallel",),
            vmem_limit_bytes=_VMEM_LIMIT,
        ),
    )(x2d)

    return out2d.reshape(-1)[:n].reshape(orig_shape)


def simple_classifier_forward(x, w, b, nz):
    """x: (B, nz) float32. w: (nz, n_out) (PyTorch weight pre-transposed).
    b: (n_out,). Returns sigmoid(x @ w + b), or sigmoid(x) when nz == 1."""
    if nz == 1:
        # PyTorch path: torch.sigmoid(x) directly (Linear is skipped).
        return _sigmoid_only(x)

    B = x.shape[0]
    n_out = w.shape[1]
    dtype = x.dtype

    # --- lane-dense output: pad n_out up to a multiple of 128 -------------
    n_pad = _round_up(n_out, _LANES)
    w_pad = jnp.pad(w.astype(jnp.float32), ((0, 0), (0, n_pad - n_out)))
    b_pad = jnp.pad(b.astype(jnp.float32), (0, n_pad - n_out)).reshape(1, n_pad)

    # --- batch tiling: multiple of 8 sublanes, streamed through the grid ---
    b_rows = _round_up(B, _SUBLANES)
    if b_rows != B:
        x = jnp.pad(x, ((0, b_rows - B), (0, 0)))
    tile_b = min(512, b_rows)
    grid = (pl.cdiv(b_rows, tile_b),)

    out_pad = pl.pallas_call(
        _linear_sigmoid_kernel,
        out_shape=jax.ShapeDtypeStruct((b_rows, n_pad), dtype),
        grid=grid,
        in_specs=[
            pl.BlockSpec((tile_b, nz), lambda i: (i, 0)),   # streamed per tile
            pl.BlockSpec((nz, n_pad), lambda i: (0, 0)),    # resident weight
            pl.BlockSpec((1, n_pad), lambda i: (0, 0)),     # resident bias
        ],
        out_specs=pl.BlockSpec((tile_b, n_pad), lambda i: (i, 0)),
        compiler_params=pltpu.CompilerParams(
            dimension_semantics=("parallel",),
            vmem_limit_bytes=_VMEM_LIMIT,
        ),
    )(x, w_pad, b_pad)

    # Slice away batch padding and the lane-padded output columns.
    return out_pad[:B, :n_out]


# --------------------------------------------------------------------------
# Self-test
# --------------------------------------------------------------------------
if __name__ == "__main__":
    # Small shapes consistent with the module: batch=8, nz=32, n_out=1.
    B, nz, n_out = 8, 32, 1
    key = jax.random.PRNGKey(0)
    kx, kw, kb = jax.random.split(key, 3)

    x = jax.random.normal(kx, (B, nz), dtype=jnp.float32)

    # nn.Linear-style init: U(-1/sqrt(nz), 1/sqrt(nz)); weight stored as
    # (nz, n_out) == PyTorch weight (n_out, nz) transposed.
    bound = 1.0 / (nz ** 0.5)
    w = jax.random.uniform(kw, (nz, n_out), jnp.float32, -bound, bound)
    b = jax.random.uniform(kb, (n_out,), jnp.float32, -bound, bound)

    # nz > 1 path: sigmoid(Linear(x)).
    out = simple_classifier_forward(x, w, b, nz)
    out = jax.block_until_ready(out)
    ref = jax.nn.sigmoid(x @ w + b[None, :])
    assert out.shape == (B, n_out)
    assert jnp.allclose(out, ref, atol=1e-5, rtol=1e-5)

    # nz == 1 path: sigmoid(x) directly (Linear skipped, matching PyTorch).
    x1 = jax.random.normal(kx, (B, 1), dtype=jnp.float32)
    out1 = simple_classifier_forward(x1, w[:1, :], b, 1)
    out1 = jax.block_until_ready(out1)
    assert out1.shape == (B, 1)
    assert jnp.allclose(out1, jax.nn.sigmoid(x1), atol=1e-5, rtol=1e-5)

    print("KERNEL_OK")
</pallas_src>

<mosaic_0001>
module attributes {stable_mosaic.version = 11 : i64} {
  func.func @_linear_sigmoid_kernel(%arg0: i32, %arg1: memref<8x32xf32, #tpu.memory_space<vmem>>, %arg2: memref<32x128xf32, #tpu.memory_space<vmem>>, %arg3: memref<1x128xf32, #tpu.memory_space<vmem>>, %arg4: memref<8x128xf32, #tpu.memory_space<vmem>>) attributes {dimension_semantics = [#tpu.dimension_semantics<parallel>], iteration_bounds = array<i64: 1>, scalar_prefetch = 0 : i64, scratch_operands = 0 : i64, tpu.core_type = #tpu.core_type<tc>, window_params = [{transform_indices = @transform_0, window_bounds = array<i64: 8, 32>}, {pipeline_mode = #tpu.pipeline_mode<synchronous>, transform_indices = @transform_1, window_bounds = array<i64: 32, 128>}, {pipeline_mode = #tpu.pipeline_mode<synchronous>, transform_indices = @transform_2, window_bounds = array<i64: 1, 128>}, {transform_indices = @transform_3, window_bounds = array<i64: 8, 128>}]} {
    %c0 = arith.constant 0 : index
    %c0_0 = arith.constant 0 : index
    %0 = vector.load %arg1[%c0, %c0_0] : memref<8x32xf32, #tpu.memory_space<vmem>>, vector<8x32xf32>
    %c0_1 = arith.constant 0 : index
    %c0_2 = arith.constant 0 : index
    %1 = vector.load %arg2[%c0_1, %c0_2] : memref<32x128xf32, #tpu.memory_space<vmem>>, vector<32x128xf32>
    %cst = arith.constant dense<0.000000e+00> : vector<8x128xf32>
    %2 = tpu.matmul %0, %1, %cst {dimension_numbers = #tpu.dot_dimension_numbers<[1], [0], [0], [1], [0, 0, 1, 1], [], []>} : vector<8x32xf32>, vector<32x128xf32>, vector<8x128xf32> -> vector<8x128xf32>
    %c0_3 = arith.constant 0 : index
    %c0_4 = arith.constant 0 : index
    %3 = vector.load %arg3[%c0_3, %c0_4] : memref<1x128xf32, #tpu.memory_space<vmem>>, vector<1x128xf32>
    %4 = vector.broadcast %3 : vector<1x128xf32> to vector<8x128xf32>
    %5 = arith.addf %2, %4 : vector<8x128xf32>
    %6 = arith.negf %5 : vector<8x128xf32>
    %7 = math.exp %6 : vector<8x128xf32>
    %cst_5 = arith.constant 1.000000e+00 : f32
    %8 = vector.broadcast %cst_5 : f32 to vector<8x128xf32>
    %9 = arith.addf %8, %7 : vector<8x128xf32>
    %10 = arith.divf %8, %9 : vector<8x128xf32>
    %c0_6 = arith.constant 0 : index
    %c0_7 = arith.constant 0 : index
    %11 = vector.load %arg4[%c0_6, %c0_7] : memref<8x128xf32, #tpu.memory_space<vmem>>, vector<8x128xf32>
    tpu.vector_store %arg4[%c0_6, %c0_7], %10 {strides = array<i32>} : memref<8x128xf32, #tpu.memory_space<vmem>>, vector<8x128xf32>,
    return
  }
  func.func @transform_0(%arg0: i32) -> (i32, i32) {
    %c0_i32 = arith.constant 0 : i32
    %c0_i32_0 = arith.constant 0 : i32
    return %arg0, %c0_i32 : i32, i32
  }
  func.func @transform_1(%arg0: i32) -> (i32, i32) {
    %c0_i32 = arith.constant 0 : i32
    %c0_i32_0 = arith.constant 0 : i32
    %c0_i32_1 = arith.constant 0 : i32
    return %c0_i32, %c0_i32_0 : i32, i32
  }
  func.func @transform_2(%arg0: i32) -> (i32, i32) {
    %c0_i32 = arith.constant 0 : i32
    %c0_i32_0 = arith.constant 0 : i32
    %c0_i32_1 = arith.constant 0 : i32
    return %c0_i32, %c0_i32_0 : i32, i32
  }
  func.func @transform_3(%arg0: i32) -> (i32, i32) {
    %c0_i32 = arith.constant 0 : i32
    %c0_i32_0 = arith.constant 0 : i32
    return %arg0, %c0_i32 : i32, i32
  }
}

</mosaic_0001>

<bundles_post_ra>
// kernel: tpu_custom_call.1
= control target key start
LH: loop header
LB: loop body
LE: loop exit
PB: predicated region body
PF: predicated region fallthrough
CT: control target
= control target key end

     0   :  { %8 = vsyncpa [#allocation3], 0  ;;  %s285_s0 = inlined_call_operand.hbm [shape: f32[8,32], index: 0, kind: input, shape index: {}]   ;;  %s286_s1 = inlined_call_operand.hbm [shape: f32[32,128], index: 1, kind: input, shape index: {}]   ;;  %s287_s2 = inlined_call_operand.vmem [shape: f32[1,128], index: 2, kind: input, shape index: {}]   ;;  %s288_s3 = inlined_call_operand.hbm [shape: f32[8,128], index: 3, kind: output, shape index: {}]  }
   0x1   :  { %9 = vsyncpa [#allocation6], 0 }
   0x2   :  { %10 = vsyncpa [#allocation4], 0  ;;  %s246_s12 = smov [#allocation2]   ;;  %s247_s14 = smov [#allocation5]  }
   0x3   :  { %s17_s13 = sshll.u32 %s246_s12, 4  ;;  %s26_s15 = sshll.u32 %s247_s14, 4  ;;  %s18_s13 = int_to_ptr.vmem [resolvable:$true] %s17_s13  ;;  %s27_s15 = int_to_ptr.vmem [resolvable:$true] %s26_s15 }
   0x4   :  { %s188_s16 = scalar_lea.vmem %s18_s13, 128  ;;  %p193_p1 = scmp.lt.s32.totalorder %s18_s13, %s18_s13 }
   0x5   :  { %p189_p0 = scmp.ne.s32.totalorder %s18_s13, %s188_s16  ;;  %p194_p2 = scmp.lt.s32.totalorder %s188_s16, %s188_s16 }
   0x7   :  { %p195_p3 = por %p194_p2, %p193_p1 }
   0x9   :  { %p196_p4 = pnand %p195_p3, %p189_p0 }
   0xb   :  { %199 = shalt.err (!%p196_p4)
}
   0xc   :  { %20 = dma.hbm_to_vmem [thread:$0]  %s285_s0, 128, %s18_s13, [#allocation3]  }
   0xd   :  { %s208_s19 = scalar_lea.vmem %s27_s15, 512  ;;  %p213_p6 = scmp.lt.s32.totalorder %s27_s15, %s27_s15 }
   0xe   :  { %p209_p5 = scmp.ne.s32.totalorder %s27_s15, %s208_s19  ;;  %p214_p7 = scmp.lt.s32.totalorder %s208_s19, %s208_s19 }
  0x10   :  { %p215_p8 = por %p214_p7, %p213_p6 }
  0x12   :  { %p216_p9 = pnand %p215_p8, %p209_p5 }
  0x14   :  { %219 = shalt.err (!%p216_p9)
}
  0x15   :  { %s248_s20 = smov 128   ;;  %s249_s21 = smov 8  }
  0x16   :  { %32 = dma.hbm_to_vmem [thread:$0]  %s286_s1, 512, %s27_s15, [#allocation6], %s248_s20, %s248_s20, %s249_s21  }
  0x17   :  { %240 = dma.done.wait [#allocation3], 128  }
  0x18   :  { %241 = vsyncadd [#allocation3], 4294967168 }
  0x19   :  { %242 = dma.done.wait [#allocation6], 512  }
  0x1a   :  { %243 = vsyncadd [#allocation6], 4294966784  ;;  %v250_v0 = vmov 0.0   ;;  %vm251_vm0 = vmmov 0   ;;  %v45_v1 = vld [vmem:[#allocation5 + $0x18] sm:$0xff]  ;;  %v44_v2 = vld [vmem:[#allocation5 + $0x10] sm:$0xff] }
  0x1b   :  { %158 = vmatprep.subr.mxu0 %v250_v0  ;;  %166 = vmatprep.mubr.msk.f32.mxu0 %vm251_vm0, %v250_v0  ;;  %v43_v3 = vld [vmem:[#allocation5 + $0x8] sm:$0xff]  ;;  %v42_v4 = vld [vmem:[#allocation5] sm:$0xff]  ;;  %v41_v5 = vld [vmem:[#allocation2] sm:$0xff]  ;;  %vm53_vm1 = vcmask 261120   ;;  %s252_s24 = smov [#allocation7]  }
  0x1c   :  { %159 = vmatpush3.msra.mxu0 %v45_v1  ;;  %v150_v6 = vld [vmem:[%s287_s2] ss:$0 sm:$0xff]  ;;  %s140_s25 = sshll.u32 %s252_s24, 4  ;;  %s141_s25 = int_to_ptr.vmem [resolvable:$true] %s140_s25 }
  0x1d   :  { %160 = vmatprep.subr.mxu0 %v250_v0  ;;  %s220_s26 = scalar_lea.vmem %s141_s25, 128  ;;  %p225_p11 = scmp.lt.s32.totalorder %s141_s25, %s141_s25 }
  0x1e   :  { %161 = vmatpush3.msra.mxu0 %v44_v2  ;;  %p221_p10 = scmp.ne.s32.totalorder %s141_s25, %s220_s26  ;;  %p226_p12 = scmp.lt.s32.totalorder %s220_s26, %s220_s26 }
  0x1f   :  { %162 = vmatprep.subr.mxu0 %v250_v0 }
  0x20   :  { %163 = vmatpush3.msra.mxu0 %v43_v3  ;;  %p227_p13 = por %p226_p12, %p225_p11 }
  0x21   :  { %164 = vmatprep.subr.mxu0 %v250_v0 }
  0x22   :  { %165 = vmatpush3.msra.mxu0 %v42_v4  ;;  %p228_p0 = pnand %p227_p13, %p221_p10 }
  0x23   :  { %167 = vmatmul.mubr.msk.f32.vlgmr.msra.gmra.mxu0 %vm53_vm1, %v41_v5 }
  0xe3   :  { %v123_v7 = vpop.f32.mrf.mxu0 }
  0xe4   :  { %v124_v8 = vadd.f32 %v150_v6, %v123_v7 }
  0xe5   :  { %v168_v9 = vpop.f32.mrf.mxu0 }
  0xe6   :  { %v152_v10 = vmul.f32 -1.442695, %v124_v8 }
  0xe8   :  { %176 = vpow2.f32 %v152_v10 }
  0xf5   :  { %v177_v11 = vpop.eup %176 }
  0xf6   :  { %v130_v12 = vadd.f32 1.0, %v177_v11 }
  0xf8   :  { %178 = vrcp.f32 %v130_v12 }
 0x105   :  { %v179_v13 = vpop.eup %178 }
 0x106   :  { %133 = vst [vmem:[#allocation7] sm:$0xff] %v179_v13 }
 0x107   :  { %231 = shalt.err (!%p228_p0)
}
 0x108   :  { %143 = dma.vmem_to_hbm [thread:$0]  %s141_s25, 128, %s288_s3, [#allocation4]  }
 0x109   :  { %244 = dma.done.wait [#allocation4], 128  }
 0x10a   :  { %245 = vsyncadd [#allocation4], 4294967168 }
 0x10b   :  { %147 = vsyncpa [#allocation3], 1 }
 0x10c   :  { %148 = vsyncpa [#allocation6], 1 }
 0x10d   :  { %149 = vsyncpa [#allocation4], 1 }

</bundles_post_ra>
